<compile_context>
chip_gen: v7x
topology: tpu7x:2x2x1
jax: 0.10.0
libtpu: 0.0.40
codegen_flags: <defaults>
</compile_context>

<pallas_src>
import functools
import math

import jax
import jax.numpy as jnp
from jax.experimental import pallas as pl
from jax.experimental.pallas import tpu as pltpu


def _round_up(x, m):
    return (x + m - 1) // m * m


def _itemsize(dt):
    return jnp.dtype(dt).itemsize


def _vmem_limit_bytes(block_bytes, margin=2 << 20):
    # Pallas double-buffers every pipelined operand block; add headroom and
    # clamp to v7x physical VMEM (64 MiB per TensorCore).
    need = 2 * int(sum(block_bytes)) + margin
    return int(min(max(need, 16 << 20), 64 << 20))


# ---------------------------------------------------------------------------
# Linear (x @ W + b), tiled over rows (tokens).
# ---------------------------------------------------------------------------
def _linear_kernel(x_ref, w_ref, b_ref, o_ref, *, compute_dtype):
    x = x_ref[...].astype(compute_dtype)
    w = w_ref[...]  # already cast to compute_dtype in the wrapper
    acc = jnp.dot(x, w, preferred_element_type=jnp.float32)
    o_ref[...] = (acc + b_ref[...]).astype(o_ref.dtype)


def _linear(x2d, w, b, *, tile_m, compute_dtype):
    M, K = x2d.shape
    Kw, n_out = w.shape
    assert K == Kw

    tile = min(int(tile_m), _round_up(M, 8))
    m_pad = _round_up(M, tile)
    if m_pad != M:
        x2d = jnp.pad(x2d, ((0, m_pad - M), (0, 0)))

    w_c = w.astype(compute_dtype)                     # halves weight DMA in bf16
    b2d = b.reshape(1, n_out).astype(jnp.float32)     # bias added in f32

    block_bytes = [
        tile * K * _itemsize(x2d.dtype),              # x tile
        K * n_out * _itemsize(w_c.dtype),             # weights (constant block)
        n_out * 4,                                    # bias
        tile * n_out * _itemsize(x2d.dtype),          # out tile
        tile * n_out * 4,                             # f32 accumulator headroom
    ]
    cost = pl.CostEstimate(
        flops=2 * m_pad * K * n_out,
        transcendentals=0,
        bytes_accessed=int(
            m_pad * K * _itemsize(x2d.dtype)
            + K * n_out * _itemsize(w_c.dtype)
            + n_out * 4
            + m_pad * n_out * _itemsize(x2d.dtype)),
    )

    out = pl.pallas_call(
        functools.partial(_linear_kernel, compute_dtype=compute_dtype),
        out_shape=jax.ShapeDtypeStruct((m_pad, n_out), x2d.dtype),
        grid_spec=pltpu.PrefetchScalarGridSpec(
            num_scalar_prefetch=0,
            grid=(m_pad // tile,),
            in_specs=[
                pl.BlockSpec((tile, K), lambda i: (i, 0)),   # x tile (pipelined)
                pl.BlockSpec((K, n_out), lambda i: (0, 0)),  # W: constant block, DMA'd once
                pl.BlockSpec((1, n_out), lambda i: (0, 0)),  # b: constant block
            ],
            out_specs=pl.BlockSpec((tile, n_out), lambda i: (i, 0)),
        ),
        compiler_params=pltpu.CompilerParams(
            dimension_semantics=("parallel",),
            vmem_limit_bytes=_vmem_limit_bytes(block_bytes),
        ),
        cost_estimate=cost,
    )(x2d, w_c, b2d)

    return out[:M] if m_pad != M else out


# ---------------------------------------------------------------------------
# Scaled-dot-product attention, one (batch, head) per grid step.
# ---------------------------------------------------------------------------
def _attn_kernel(q_ref, k_ref, v_ref, o_ref, *, scale, compute_dtype):
    q = q_ref[...].astype(compute_dtype)     # (N, d)
    k = k_ref[...].astype(compute_dtype)     # (N, d)
    v = v_ref[...].astype(compute_dtype)     # (N, d)

    # scores = q @ k^T (f32 MXU accumulation), then scale
    s = jax.lax.dot_general(
        q, k, (((1,), (1,)), ((), ())),
        preferred_element_type=jnp.float32) * scale

    # numerically stable softmax over keys (exp runs on the EUP slot)
    m = jnp.max(s, axis=-1, keepdims=True)
    p = jnp.exp(s - m)
    p = p / jnp.sum(p, axis=-1, keepdims=True)

    # attention_dropout -> identity (eval mode)

    ctx = jnp.dot(p.astype(compute_dtype), v, preferred_element_type=jnp.float32)
    o_ref[...] = ctx.astype(o_ref.dtype)


def _attention(q, k, v, *, scale, compute_dtype):
    B, H, N, d = q.shape

    def spec():
        # (batch, head) squeezed out; kernel sees (N, d) refs.
        return pl.BlockSpec((None, None, N, d), lambda b, h: (b, h, 0, 0))

    block_bytes = [
        3 * N * d * _itemsize(q.dtype),   # q, k, v blocks
        N * d * _itemsize(q.dtype),       # out block
        2 * N * N * 4,                    # f32 scores / probs temporaries
    ]
    cost = pl.CostEstimate(
        flops=4 * B * H * N * N * d,
        transcendentals=B * H * N * N,
        bytes_accessed=int(4 * B * H * N * d * _itemsize(q.dtype)),
    )

    return pl.pallas_call(
        functools.partial(_attn_kernel, scale=scale, compute_dtype=compute_dtype),
        out_shape=jax.ShapeDtypeStruct((B, H, N, d), q.dtype),
        grid_spec=pltpu.PrefetchScalarGridSpec(
            num_scalar_prefetch=0,
            grid=(B, H),
            in_specs=[spec(), spec(), spec()],
            out_specs=spec(),
        ),
        compiler_params=pltpu.CompilerParams(
            dimension_semantics=("parallel", "parallel"),
            vmem_limit_bytes=_vmem_limit_bytes(block_bytes),
        ),
        cost_estimate=cost,
    )(q, k, v)


# ---------------------------------------------------------------------------
# Full MultiHeadAttention forward.
# ---------------------------------------------------------------------------
def multi_head_attention(x, w_qkv, b_qkv, w_out, b_out, *, heads,
                         tile_m=256, compute_dtype=None):
    """x: (B, N, C); weights stored (in_features, out_features). Returns (B, N, C)."""
    B, N, C = x.shape
    assert C % heads == 0
    d = C // heads
    scale = d ** (-0.5)
    if compute_dtype is None:
        # Pass bf16 inputs (or compute_dtype=jnp.bfloat16) in production for
        # full MXU throughput; f32 inputs keep f32 compute for fidelity.
        compute_dtype = x.dtype

    x2d = x.reshape(B * N, C)

    # 1) fused QKV projection
    qkv = _linear(x2d, w_qkv, b_qkv, tile_m=tile_m, compute_dtype=compute_dtype)
    qkv = qkv.reshape(B, N, 3, heads, d).transpose(2, 0, 3, 1, 4)   # (3, B, H, N, d)
    q, k, v = qkv[0], qkv[1], qkv[2]

    # 2) per-(batch, head) attention
    ctx = _attention(q, k, v, scale=scale, compute_dtype=compute_dtype)  # (B, H, N, d)
    ctx2d = ctx.transpose(0, 2, 1, 3).reshape(B * N, C)

    # 3) output projection; dropout -> identity (eval mode)
    out = _linear(ctx2d, w_out, b_out, tile_m=tile_m, compute_dtype=compute_dtype)
    return out.reshape(B, N, C)


def init_params(key, dim, dtype=jnp.float32):
    """Mimics nn.Linear default init: uniform(-1/sqrt(fan_in), +1/sqrt(fan_in))."""
    k1, k2, k3, k4 = jax.random.split(key, 4)
    bound = 1.0 / math.sqrt(dim)
    w_qkv = jax.random.uniform(k1, (dim, 3 * dim), dtype, -bound, bound)
    b_qkv = jax.random.uniform(k2, (3 * dim,), dtype, -bound, bound)
    w_out = jax.random.uniform(k3, (dim, dim), dtype, -bound, bound)
    b_out = jax.random.uniform(k4, (dim,), dtype, -bound, bound)
    return w_qkv, b_qkv, w_out, b_out


if __name__ == "__main__":
    key = jax.random.PRNGKey(0)
    kx, kp = jax.random.split(key)

    B, N, C, heads = 2, 8, 32, 8            # small ViT-like shapes (head_dim = 4)
    x = jax.random.normal(kx, (B, N, C), jnp.float32)
    w_qkv, b_qkv, w_out, b_out = init_params(kp, C)

    out = multi_head_attention(x, w_qkv, b_qkv, w_out, b_out, heads=heads)
    out = jax.block_until_ready(out)

    # pure-JAX reference (eval-mode MultiHeadAttention)
    d = C // heads
    scale = d ** (-0.5)
    qkv_ref = (x @ w_qkv + b_qkv).reshape(B, N, 3, heads, d).transpose(2, 0, 3, 1, 4)
    q_r, k_r, v_r = qkv_ref[0], qkv_ref[1], qkv_ref[2]
    attn = jax.nn.softmax((q_r @ jnp.swapaxes(k_r, -2, -1)) * scale, axis=-1)
    ctx_r = (attn @ v_r).transpose(0, 2, 1, 3).reshape(B, N, C)
    ref = ctx_r @ w_out + b_out

    assert out.shape == (B, N, C)
    err = float(jnp.max(jnp.abs(out - ref)))
    assert jnp.allclose(out, ref, atol=1e-4, rtol=1e-4), f"max abs err {err}"

    print("KERNEL_OK")
</pallas_src>

<mosaic_0001>
module attributes {stable_mosaic.version = 11 : i64} {
  func.func @_linear_kernel(%arg0: i32, %arg1: memref<16x32xf32, #tpu.memory_space<vmem>>, %arg2: memref<32x96xf32, #tpu.memory_space<vmem>>, %arg3: memref<1x96xf32, #tpu.memory_space<vmem>>, %arg4: memref<16x96xf32, #tpu.memory_space<vmem>>) attributes {dimension_semantics = [#tpu.dimension_semantics<parallel>], iteration_bounds = array<i64: 1>, scalar_prefetch = 0 : i64, scratch_operands = 0 : i64, tpu.core_type = #tpu.core_type<tc>, window_params = [{transform_indices = @transform_0, window_bounds = array<i64: 16, 32>}, {pipeline_mode = #tpu.pipeline_mode<synchronous>, transform_indices = @transform_1, window_bounds = array<i64: 32, 96>}, {pipeline_mode = #tpu.pipeline_mode<synchronous>, transform_indices = @transform_2, window_bounds = array<i64: 1, 96>}, {transform_indices = @transform_3, window_bounds = array<i64: 16, 96>}]} {
    %c0 = arith.constant 0 : index
    %c0_0 = arith.constant 0 : index
    %0 = vector.load %arg1[%c0, %c0_0] : memref<16x32xf32, #tpu.memory_space<vmem>>, vector<16x32xf32>
    %c0_1 = arith.constant 0 : index
    %c0_2 = arith.constant 0 : index
    %1 = vector.load %arg2[%c0_1, %c0_2] : memref<32x96xf32, #tpu.memory_space<vmem>>, vector<32x96xf32>
    %cst = arith.constant dense<0.000000e+00> : vector<16x96xf32>
    %2 = tpu.matmul %0, %1, %cst {dimension_numbers = #tpu.dot_dimension_numbers<[1], [0], [0], [1], [0, 0, 1, 1], [], []>} : vector<16x32xf32>, vector<32x96xf32>, vector<16x96xf32> -> vector<16x96xf32>
    %c0_3 = arith.constant 0 : index
    %c0_4 = arith.constant 0 : index
    %3 = vector.load %arg3[%c0_3, %c0_4] : memref<1x96xf32, #tpu.memory_space<vmem>>, vector<1x96xf32>
    %4 = vector.broadcast %3 : vector<1x96xf32> to vector<16x96xf32>
    %5 = arith.addf %2, %4 : vector<16x96xf32>
    %c0_5 = arith.constant 0 : index
    %c0_6 = arith.constant 0 : index
    %6 = vector.load %arg4[%c0_5, %c0_6] : memref<16x96xf32, #tpu.memory_space<vmem>>, vector<16x96xf32>
    tpu.vector_store %arg4[%c0_5, %c0_6], %5 {strides = array<i32>} : memref<16x96xf32, #tpu.memory_space<vmem>>, vector<16x96xf32>,
    return
  }
  func.func @transform_0(%arg0: i32) -> (i32, i32) {
    %c0_i32 = arith.constant 0 : i32
    %c0_i32_0 = arith.constant 0 : i32
    return %arg0, %c0_i32 : i32, i32
  }
  func.func @transform_1(%arg0: i32) -> (i32, i32) {
    %c0_i32 = arith.constant 0 : i32
    %c0_i32_0 = arith.constant 0 : i32
    %c0_i32_1 = arith.constant 0 : i32
    return %c0_i32, %c0_i32_0 : i32, i32
  }
  func.func @transform_2(%arg0: i32) -> (i32, i32) {
    %c0_i32 = arith.constant 0 : i32
    %c0_i32_0 = arith.constant 0 : i32
    %c0_i32_1 = arith.constant 0 : i32
    return %c0_i32, %c0_i32_0 : i32, i32
  }
  func.func @transform_3(%arg0: i32) -> (i32, i32) {
    %c0_i32 = arith.constant 0 : i32
    %c0_i32_0 = arith.constant 0 : i32
    return %arg0, %c0_i32 : i32, i32
  }
}

</mosaic_0001>

<bundles_post_ra>
// kernel: tpu_custom_call.1
= control target key start
LH: loop header
LB: loop body
LE: loop exit
PB: predicated region body
PF: predicated region fallthrough
CT: control target
= control target key end

     0   :  { %8 = vsyncpa [#allocation3], 0  ;;  %s337_s0 = inlined_call_operand.hbm [shape: f32[16,32], index: 0, kind: input, shape index: {}]   ;;  %s338_s1 = inlined_call_operand.hbm [shape: f32[32,96], index: 1, kind: input, shape index: {}]   ;;  %s339_s2 = inlined_call_operand.vmem [shape: f32[1,96], index: 2, kind: input, shape index: {}]   ;;  %s340_s3 = inlined_call_operand.hbm [shape: f32[16,96], index: 3, kind: output, shape index: {}]  }
   0x1   :  { %9 = vsyncpa [#allocation6], 0 }
   0x2   :  { %10 = vsyncpa [#allocation4], 0  ;;  %s264_s12 = smov [#allocation2]   ;;  %s192_s16 = scalar_lea.hbm %s337_s0, 256 }
   0x3   :  { %s16_s13 = sshll.u32 %s264_s12, 4  ;;  %p193_p0 = scmp.ne.s32.totalorder %s337_s0, %s192_s16  ;;  %s17_s13 = int_to_ptr.vmem [resolvable:$true] %s16_s13 }
   0x4   :  { %p196_p1 = scmp.lt.u32.totalorder %s192_s16, %s337_s0 }
   0x6   :  { %p198_p2 = pnand %p196_p1, %p193_p0 }
   0x8   :  { %201 = shalt.err (!%p198_p2)
}
   0x9   :  { %s202_s21 = scalar_lea.vmem %s17_s13, 256  ;;  %p207_p4 = scmp.lt.s32.totalorder %s17_s13, %s17_s13 }
   0xa   :  { %p203_p3 = scmp.ne.s32.totalorder %s17_s13, %s202_s21  ;;  %p208_p5 = scmp.lt.s32.totalorder %s202_s21, %s202_s21 }
   0xc   :  { %p209_p6 = por %p208_p5, %p207_p4 }
   0xe   :  { %p210_p7 = pnand %p209_p6, %p203_p3 }
  0x10   :  { %213 = shalt.err (!%p210_p7)
}
  0x11   :  { %s265_s22 = smov 128   ;;  %s266_s23 = smov 8  }
  0x12   :  { %22 = dma.hbm_to_vmem [thread:$0]  %s337_s0, 256, %s17_s13, [#allocation3], %s265_s22, %s265_s22, %s266_s23  }
  0x13   :  { %s267_s26 = smov [#allocation5]   ;;  %s214_s30 = scalar_lea.hbm %s338_s1, 512 }
  0x14   :  { %s28_s27 = sshll.u32 %s267_s26, 4  ;;  %p215_p8 = scmp.ne.s32.totalorder %s338_s1, %s214_s30  ;;  %s29_s27 = int_to_ptr.vmem [resolvable:$true] %s28_s27 }
  0x15   :  { %p218_p9 = scmp.lt.u32.totalorder %s214_s30, %s338_s1 }
  0x17   :  { %p220_p10 = pnand %p218_p9, %p215_p8 }
  0x19   :  { %223 = shalt.err (!%p220_p10)
}
  0x1a   :  { %s224_s8 = scalar_lea.vmem %s29_s27, 512  ;;  %p229_p12 = scmp.lt.s32.totalorder %s29_s27, %s29_s27 }
  0x1b   :  { %p225_p11 = scmp.ne.s32.totalorder %s29_s27, %s224_s8  ;;  %p230_p13 = scmp.lt.s32.totalorder %s224_s8, %s224_s8 }
  0x1d   :  { %p231_p0 = por %p230_p13, %p229_p12 }
  0x1f   :  { %p232_p1 = pnand %p231_p0, %p225_p11 }
  0x21   :  { %235 = shalt.err (!%p232_p1)
}
  0x22   :  { %34 = dma.hbm_to_vmem [thread:$0]  %s338_s1, 512, %s29_s27, [#allocation6], %s265_s22, %s265_s22, %s266_s23  }
  0x23   :  { %258 = dma.done.wait [#allocation3], 256  }
  0x24   :  { %259 = vsyncadd [#allocation3], 4294967040 }
  0x25   :  { %260 = dma.done.wait [#allocation6], 512  }
  0x26   :  { %261 = vsyncadd [#allocation6], 4294966784  ;;  %vm56_vm0 = vcmask 261120   ;;  %v45_v0 = vld [vmem:[#allocation5] sm:$0xff]  ;;  %v46_v1 = vld [vmem:[#allocation5 + $0x8] sm:$0xff]  ;;  %s268_s11 = smov [#allocation7]  }
  0x27   :  { %v47_v2 = vld [vmem:[#allocation5 + $0x10] sm:$0xff]  ;;  %v179_v3 = vpack.c.bf16 %v46_v1, %v45_v0  ;;  %v48_v4 = vld [vmem:[#allocation5 + $0x18] sm:$0xff]  ;;  %s146_s12 = sshll.u32 %s268_s11, 4  ;;  %vm138_vm1 = vcmask 785408   ;;  %s147_s12 = int_to_ptr.vmem [resolvable:$true] %s146_s12 }
  0x28   :  { %v43_v5 = vld [vmem:[#allocation2] sm:$0xff]  ;;  %v183_v6 = vpack.c.bf16 %v48_v4, %v47_v2  ;;  %v44_v7 = vld [vmem:[#allocation2 + $0x8] sm:$0xff]  ;;  %s236_s13 = scalar_lea.vmem %s147_s12, 256  ;;  %p241_p3 = scmp.lt.s32.totalorder %s147_s12, %s147_s12 }
  0x29   :  { %176 = vmatprep.mubr.msk.f32.mxu0 %vm56_vm0, %v43_v5  ;;  %180 = vmatprep.subr.bf16.mxu0 %v179_v3  ;;  %v159_v8 = vld [vmem:[%s339_s2] ss:$0 sm:$0xff]  ;;  %p237_p2 = scmp.ne.s32.totalorder %s147_s12, %s236_s13  ;;  %p242_p4 = scmp.lt.s32.totalorder %s236_s13, %s236_s13 }
  0x2a   :  { %182 = vmatpush3.bf16.msra.mxu0 %v179_v3 }
  0x2b   :  { %184 = vmatprep.subr.bf16.mxu0 %v183_v6  ;;  %p243_p5 = por %p242_p4, %p241_p3 }
  0x2d   :  { %p244_p6 = pnand %p243_p5, %p237_p2 }
  0x2e   :  { %186 = vmatpush3.bf16.msra.mxu0 %v183_v6 }
  0x31   :  { %177 = vmatmul.mubr.msk.f32.vlgmr.msra.gmra.mrb[0].mxu0 %vm56_vm0, %v44_v7 }
 0x104   :  { %v178_v9 = vpop.f32.mrb[0].mxu0 }
 0x105   :  { %v135_v10 = vadd.f32 %v178_v9, %v159_v8  ;;  %v129_v11 = vpop.f32.mrb[1].mxu0 }
 0x106   :  { %v130_v12 = vadd.f32 %v159_v8, %v129_v11 }
 0x107   :  { %140 = vst.msk [vmem:[#allocation7 + $0x8] sm:$0xff] %vm138_vm1, %v135_v10 }
 0x108   :  { %139 = vst.msk [vmem:[#allocation7] sm:$0xff] %vm138_vm1, %v130_v12 }
 0x109   :  { %247 = shalt.err (!%p244_p6)
}
 0x10a   :  { %s248_s2 = scalar_lea.hbm %s340_s3, 256 }
 0x10b   :  { %p249_p7 = scmp.ne.s32.totalorder %s340_s3, %s248_s2  ;;  %p252_p8 = scmp.lt.u32.totalorder %s248_s2, %s340_s3 }
 0x10d   :  { %p254_p9 = pnand %p252_p8, %p249_p7 }
 0x10f   :  { %257 = shalt.err (!%p254_p9)
}
 0x110   :  { %152 = dma.vmem_to_hbm [thread:$0]  %s147_s12, 256, %s340_s3, [#allocation4], %s265_s22, %s265_s22, %s266_s23  }
 0x111   :  { %262 = dma.done.wait [#allocation4], 256  }
 0x112   :  { %263 = vsyncadd [#allocation4], 4294967040 }
 0x113   :  { %156 = vsyncpa [#allocation3], 1 }
 0x114   :  { %157 = vsyncpa [#allocation6], 1 }
 0x115   :  { %158 = vsyncpa [#allocation4], 1 }

</bundles_post_ra>
